<compile_context>
chip_gen: v6e
topology: v6e:2x2x1
jax: 0.10.0
libtpu: 0.0.40
codegen_flags: <defaults>
</compile_context>

<pallas_src>
import functools
from typing import NamedTuple

import numpy as np
import jax
import jax.numpy as jnp
from jax import lax
from jax.experimental import pallas as pl
from jax.experimental.pallas import tpu as pltpu


# ---------------------------------------------------------------------------
# Trace-time planning helpers (all shapes are static).
# ---------------------------------------------------------------------------
def _cdiv(a, b):
    return -(-a // b)


def _round_up(x, m):
    return _cdiv(x, m) * m


def _round_down(x, m):
    return (x // m) * m


def _vmem_capacity_bytes():
    # Physical VMEM of the attached chip; fall back to the smallest current part (v7x).
    try:
        return int(pltpu.get_tpu_info().vmem_capacity_bytes)
    except Exception:
        return 64 * 1024 * 1024


_MAX_TM = 32 * 1024      # lanes per M tile; beyond this the per-step overhead is already <1%
_LANE_CHUNK = 2048       # lane chunk for dot+bias+store (keeps the f32 intermediate small)
_MIN_PARALLEL_STEPS = 4  # >= 2 parallel steps per TensorCore on dual-core (v7x) parts


class _Plan(NamedTuple):
    tm: int
    m_tiles: int
    chunk: int
    n_chunks: int
    k_tiled: bool
    tk: int
    n_k: int
    vmem_limit: int


def _pick_chunk(tm):
    if tm <= _LANE_CHUNK:
        return tm, 1
    for c in (_LANE_CHUNK, 1024, 512, 256, 128):
        if tm % c == 0:
            return c, tm // c
    return tm, 1  # tm not a multiple of 128 => it is the full (untiled) M axis; one chunk


def _force_min_parallel(tm, m_tiles, M, N):
    # Megacore / dual-TensorCore: avoid a 1-2 step parallel grid that would idle a core.
    if N * m_tiles < _MIN_PARALLEL_STEPS and M > 128:
        want_m_tiles = _cdiv(_MIN_PARALLEL_STEPS, N)
        tm = max(128, _round_up(_cdiv(M, want_m_tiles), 128))
        m_tiles = _cdiv(M, tm)
    return tm, m_tiles


def _plan_tiles(*, N, K, Cout, M, in_esize, out_esize):
    vmem_cap = _vmem_capacity_bytes()
    # Working-set budget for the pipelined blocks; leave the rest of VMEM for Mosaic's
    # internal scratch and whatever XLA keeps resident around the kernel.
    budget = max(8 << 20, min(vmem_cap // 4, 32 << 20))
    vmem_limit = int(min(vmem_cap - (8 << 20), 2 * budget))

    cout_pad = _round_up(Cout, 8)
    # Resident weight + bias (assume double-buffered), with VMEM lane/sublane padding.
    weight_bytes = 2 * cout_pad * _round_up(K, 128) * in_esize + cout_pad * 128 * 4
    # Double-buffered patch block + double-buffered output block, per output lane.
    lane_bytes = 2 * K * in_esize + 2 * Cout * out_esize

    if weight_bytes + 128 * lane_bytes <= budget:
        # Common case: the whole K axis is resident every step (no K tiling).
        tm_cap = min(_MAX_TM,
                     max(128, _round_down((budget - weight_bytes) // lane_bytes, 128)))
        tm = M if M <= tm_cap else tm_cap
        m_tiles = _cdiv(M, tm)
        tm, m_tiles = _force_min_parallel(tm, m_tiles, M, N)
        chunk, n_chunks = _pick_chunk(tm)
        return _Plan(tm, m_tiles, chunk, n_chunks, False, K, 1, vmem_limit)

    # Fallback for very large Cin (K = 4*Cin in the many thousands): tile K as the
    # innermost ("arbitrary") grid axis and accumulate in an f32 VMEM scratch.
    tm = M if M <= 512 else 512
    tm_pad = _round_up(tm, 128)
    fixed = tm_pad * Cout * (2 * out_esize + 4) + cout_pad * 128 * 4   # out blocks + acc + bias
    per_k_row = 2 * tm_pad * in_esize + 2 * cout_pad * in_esize        # patch + weight blocks
    tk = _round_down(max(128, (budget - fixed) // per_k_row), 128)
    tk = max(128, min(tk, _round_up(K, 128)))
    n_k = _cdiv(K, tk)
    m_tiles = _cdiv(M, tm)
    tm, m_tiles = _force_min_parallel(tm, m_tiles, M, N)
    chunk, n_chunks = _pick_chunk(tm)
    return _Plan(tm, m_tiles, chunk, n_chunks, True, tk, n_k, vmem_limit)


# ---------------------------------------------------------------------------
# Pallas kernels.
# ---------------------------------------------------------------------------
def _lane_chunked_matmul(w, p_ref, emit, *, chunk, n_chunks):
    """Calls emit(lane_slice, f32_partial) once per lane chunk of the current block so the
    (Cout, tm) f32 intermediate never has to live whole in the vreg file."""
    if n_chunks == 1:
        emit(slice(None), jnp.dot(w, p_ref[0], preferred_element_type=jnp.float32))
        return

    def body(c, carry):
        off = pl.multiple_of(c * chunk, chunk)
        sl = pl.ds(off, chunk)
        emit(sl, jnp.dot(w, p_ref[0, :, sl], preferred_element_type=jnp.float32))
        return carry

    lax.fori_loop(0, n_chunks, body, 0, unroll=min(n_chunks, 8))


def _downsample_kernel(p_ref, w_ref, b_ref, o_ref, *, chunk, n_chunks):
    # p_ref: (1, K, tm)     patch-transposed tile (lanes = output pixels, dense)
    # w_ref: (Cout, K)      conv weight as a dense matrix (resident)
    # b_ref: (Cout, 1)      conv bias, f32
    # o_ref: (1, Cout, tm)  flat-NCHW output tile (lanes = output pixels, dense)
    w = w_ref[...]
    b = b_ref[...]

    def emit(sl, acc_f32):
        o_ref[0, :, sl] = (acc_f32 + b).astype(o_ref.dtype)

    _lane_chunked_matmul(w, p_ref, emit, chunk=chunk, n_chunks=n_chunks)


def _downsample_kernel_ktiled(p_ref, w_ref, b_ref, o_ref, acc_ref, *, chunk, n_chunks):
    # Same as above but K is the innermost ("arbitrary") grid axis; partial products are
    # accumulated in an f32 VMEM scratch and flushed on the last K step.
    k = pl.program_id(2)

    @pl.when(k == 0)
    def _init():
        acc_ref[...] = jnp.zeros_like(acc_ref)

    w = w_ref[...]

    def emit(sl, acc_f32):
        acc_ref[:, sl] += acc_f32

    _lane_chunked_matmul(w, p_ref, emit, chunk=chunk, n_chunks=n_chunks)

    @pl.when(k == pl.num_programs(2) - 1)
    def _flush():
        o_ref[0] = (acc_ref[...] + b_ref[...]).astype(o_ref.dtype)


# ---------------------------------------------------------------------------
# pallas_call wrapper: out(N, Cout, M) = W @ patchesT + b.
# ---------------------------------------------------------------------------
def _conv_as_matmul(patches_t, w_mat, bias2d, *, out_dtype):
    """patches_t: (N, K, M), w_mat: (Cout, K), bias2d: (Cout, 1) f32
       -> (N, Cout, M) in out_dtype (flat NCHW output)."""
    N, K, M = patches_t.shape
    Cout = w_mat.shape[0]
    in_esize = patches_t.dtype.itemsize
    out_esize = np.dtype(out_dtype).itemsize

    plan = _plan_tiles(N=N, K=K, Cout=Cout, M=M, in_esize=in_esize, out_esize=out_esize)

    cost = pl.CostEstimate(
        flops=2 * N * Cout * K * M,
        transcendentals=0,
        bytes_accessed=N * M * (K * in_esize + Cout * out_esize) + Cout * K * in_esize,
    )
    # allow_input_fusion (one bool per operand): let XLA fuse the patch-transpose
    # producer of operand 0 into the kernel's input read so patches_t is never written
    # to HBM (review item #1).  Harmless if XLA declines to fuse.
    common_params = dict(
        vmem_limit_bytes=plan.vmem_limit,
        allow_input_fusion=[True, False, False],
    )
    out_shape = jax.ShapeDtypeStruct((N, Cout, M), out_dtype)

    if not plan.k_tiled:
        kernel = functools.partial(_downsample_kernel,
                                   chunk=plan.chunk, n_chunks=plan.n_chunks)
        return pl.pallas_call(
            kernel,
            out_shape=out_shape,
            grid_spec=pltpu.PrefetchScalarGridSpec(
                num_scalar_prefetch=0,
                grid=(N, plan.m_tiles),
                in_specs=[
                    pl.BlockSpec((1, K, plan.tm), lambda n, i: (n, 0, i)),  # patch tile
                    pl.BlockSpec((Cout, K), lambda n, i: (0, 0)),           # full weight
                    pl.BlockSpec((Cout, 1), lambda n, i: (0, 0)),           # bias
                ],
                out_specs=pl.BlockSpec((1, Cout, plan.tm), lambda n, i: (n, 0, i)),
            ),
            compiler_params=pltpu.CompilerParams(
                dimension_semantics=("parallel", "parallel"), **common_params),
            cost_estimate=cost,
        )(patches_t, w_mat, bias2d)

    # --- K-tiled fallback (huge Cin).  Pad K so every K tile is fully in bounds; OOB
    # K rows would otherwise accumulate garbage into valid output columns. -------------
    Kp = plan.n_k * plan.tk
    if Kp != K:
        patches_t = jnp.pad(patches_t, ((0, 0), (0, Kp - K), (0, 0)))
        w_mat = jnp.pad(w_mat, ((0, 0), (0, Kp - K)))
    kernel = functools.partial(_downsample_kernel_ktiled,
                               chunk=plan.chunk, n_chunks=plan.n_chunks)
    return pl.pallas_call(
        kernel,
        out_shape=out_shape,
        grid_spec=pltpu.PrefetchScalarGridSpec(
            num_scalar_prefetch=0,
            grid=(N, plan.m_tiles, plan.n_k),
            in_specs=[
                pl.BlockSpec((1, plan.tk, plan.tm), lambda n, i, k: (n, k, i)),
                pl.BlockSpec((Cout, plan.tk), lambda n, i, k: (0, k)),
                pl.BlockSpec((Cout, 1), lambda n, i, k: (0, 0)),
            ],
            out_specs=pl.BlockSpec((1, Cout, plan.tm), lambda n, i, k: (n, 0, i)),
            scratch_shapes=[pltpu.VMEM((Cout, plan.tm), jnp.float32)],
        ),
        compiler_params=pltpu.CompilerParams(
            dimension_semantics=("parallel", "parallel", "arbitrary"), **common_params),
        cost_estimate=cost,
    )(patches_t, w_mat, bias2d)


# ---------------------------------------------------------------------------
# DownsampleLayer forward.
# ---------------------------------------------------------------------------
def downsample_layer(x_nchw, weight, bias):
    """
    x_nchw : (N, Cin, H, W)    activations (f32 or bf16)
    weight : (Cout, Cin, 2, 2) Conv2d weight (PyTorch OIHW layout)
    bias   : (Cout,)           Conv2d bias
    returns (N, Cout, Ho', Wo') NCHW, with Ho'/Wo' zero-padded up to even (as the module).
    """
    N, Cin, H, W = x_nchw.shape
    Cout = weight.shape[0]
    Ho, Wo = (H - 2) // 2 + 1, (W - 2) // 2 + 1          # kernel 2, stride 2, no padding
    K, M = 4 * Cin, Ho * Wo

    # bf16 activations stay bf16 end-to-end (f32 accumulation happens inside the kernel);
    # everything else runs in f32.
    compute_dtype = jnp.bfloat16 if x_nchw.dtype == jnp.bfloat16 else jnp.float32

    # Patch-transposed operand (N, K, Ho*Wo) with k = ci*4 + kh*2 + kw.  All steps except
    # the transpose are free (contiguous) reshapes; the transpose producer is offered to
    # XLA for fusion into the kernel's input read via allow_input_fusion, so under jit it
    # should not be materialized in HBM (verify in the HLO / xprof).
    x = x_nchw[:, :, : 2 * Ho, : 2 * Wo]
    x = x.reshape(N, Cin, Ho, 2, Wo, 2)
    x = jnp.transpose(x, (0, 1, 3, 5, 2, 4))              # (N, Cin, kh, kw, Ho, Wo)
    patches_t = x.reshape(N, K, M).astype(compute_dtype)

    w_mat = weight.reshape(Cout, K).astype(compute_dtype)  # free reshape of OIHW
    bias2d = bias.reshape(Cout, 1).astype(jnp.float32)     # bias add always in f32

    out = _conv_as_matmul(patches_t, w_mat, bias2d, out_dtype=compute_dtype)
    out = out.reshape(N, Cout, Ho, Wo)                     # free split of the M axis

    # F.pad(x, (0, pad_w, 0, pad_h)) on NCHW == zero-pad right / bottom up to even H, W.
    # TODO(synk): fuse this pad into the kernel's output writeback (row-tiled out_spec);
    # kept as a plain XLA pad — low value per the perf review.
    pad_h, pad_w = Ho % 2, Wo % 2
    if pad_h or pad_w:
        out = jnp.pad(out, ((0, 0), (0, 0), (0, pad_h), (0, pad_w)))
    return out


# ---------------------------------------------------------------------------
# Pure-JAX reference for the correctness check.
# ---------------------------------------------------------------------------
def downsample_layer_ref(x_nchw, weight, bias):
    y = lax.conv_general_dilated(
        x_nchw, weight, window_strides=(2, 2), padding="VALID",
        dimension_numbers=("NCHW", "OIHW", "NCHW"),
    ) + bias.reshape(1, -1, 1, 1)
    Ho, Wo = y.shape[2], y.shape[3]
    pad_h, pad_w = Ho % 2, Wo % 2
    if pad_h or pad_w:
        y = jnp.pad(y, ((0, 0), (0, 0), (0, pad_h), (0, pad_w)))
    return y


if __name__ == "__main__":
    key = jax.random.PRNGKey(0)
    k_x, k_w, k_b, k_x2 = jax.random.split(key, 4)

    in_channels, out_channels = 4, 8

    # Deterministic synthetic parameters (nn.Conv2d init ranges / shapes).
    fan_in = in_channels * 2 * 2
    bound = 1.0 / (fan_in ** 0.5)
    weight = jax.random.uniform(k_w, (out_channels, in_channels, 2, 2),
                                jnp.float32, -bound, bound)
    bias = jax.random.uniform(k_b, (out_channels,), jnp.float32, -bound, bound)

    # jit so the patch-transpose producer and the pallas_call live in one XLA computation
    # (a prerequisite for allow_input_fusion to remove the materialized transpose).
    fwd = jax.jit(downsample_layer)

    # Case 1: even output (16 -> 8), no post-conv padding triggered.
    x1 = jax.random.normal(k_x, (2, in_channels, 16, 16), jnp.float32)
    y1 = jax.block_until_ready(fwd(x1, weight, bias))
    r1 = downsample_layer_ref(x1, weight, bias)
    assert y1.shape == (2, out_channels, 8, 8)
    assert jnp.allclose(y1, r1, atol=1e-4, rtol=1e-4)

    # Case 2: odd output (14 -> 7), exercises the pad-to-even branch (7 -> 8).
    x2 = jax.random.normal(k_x2, (2, in_channels, 14, 14), jnp.float32)
    y2 = jax.block_until_ready(fwd(x2, weight, bias))
    r2 = downsample_layer_ref(x2, weight, bias)
    assert y2.shape == (2, out_channels, 8, 8)
    assert jnp.allclose(y2, r2, atol=1e-4, rtol=1e-4)

    # Case 3: bf16 activations stay bf16 end-to-end (f32 accumulation in-kernel).
    x3 = x1.astype(jnp.bfloat16)
    y3 = jax.block_until_ready(fwd(x3, weight, bias))
    assert y3.dtype == jnp.bfloat16
    assert jnp.allclose(y3.astype(jnp.float32), r1, atol=5e-2, rtol=5e-2)

    print("KERNEL_OK")
</pallas_src>

<mosaic_0001>
module attributes {stable_mosaic.version = 11 : i64} {
  func.func @_downsample_kernel(%arg0: i32, %arg1: i32, %arg2: memref<1x16x64xf32, #tpu.memory_space<vmem>>, %arg3: memref<8x16xf32, #tpu.memory_space<vmem>>, %arg4: memref<8x1xf32, #tpu.memory_space<vmem>>, %arg5: memref<1x8x64xf32, #tpu.memory_space<vmem>>) attributes {dimension_semantics = [#tpu.dimension_semantics<parallel>, #tpu.dimension_semantics<parallel>], iteration_bounds = array<i64: 2, 1>, scalar_prefetch = 0 : i64, scratch_operands = 0 : i64, tpu.core_type = #tpu.core_type<tc>, window_params = [{transform_indices = @transform_0, window_bounds = array<i64: 1, 16, 64>}, {pipeline_mode = #tpu.pipeline_mode<synchronous>, transform_indices = @transform_1, window_bounds = array<i64: 8, 16>}, {pipeline_mode = #tpu.pipeline_mode<synchronous>, transform_indices = @transform_2, window_bounds = array<i64: 8, 1>}, {transform_indices = @transform_3, window_bounds = array<i64: 1, 8, 64>}]} {
    %c0 = arith.constant 0 : index
    %c0_0 = arith.constant 0 : index
    %0 = vector.load %arg3[%c0, %c0_0] : memref<8x16xf32, #tpu.memory_space<vmem>>, vector<8x16xf32>
    %c0_1 = arith.constant 0 : index
    %c0_2 = arith.constant 0 : index
    %1 = vector.load %arg4[%c0_1, %c0_2] : memref<8x1xf32, #tpu.memory_space<vmem>>, vector<8x1xf32>
    %c0_3 = arith.constant 0 : index
    %c0_4 = arith.constant 0 : index
    %c0_5 = arith.constant 0 : index
    %2 = vector.load %arg2[%c0_3, %c0_4, %c0_5] : memref<1x16x64xf32, #tpu.memory_space<vmem>>, vector<1x16x64xf32>
    %3 = vector.shape_cast %2 : vector<1x16x64xf32> to vector<16x64xf32>
    %cst = arith.constant dense<0.000000e+00> : vector<8x64xf32>
    %4 = tpu.matmul %0, %3, %cst {dimension_numbers = #tpu.dot_dimension_numbers<[1], [0], [0], [1], [0, 0, 1, 1], [], []>} : vector<8x16xf32>, vector<16x64xf32>, vector<8x64xf32> -> vector<8x64xf32>
    %5 = vector.broadcast %1 : vector<8x1xf32> to vector<8x64xf32>
    %6 = arith.addf %4, %5 : vector<8x64xf32>
    %c0_6 = arith.constant 0 : index
    %c0_7 = arith.constant 0 : index
    %c0_8 = arith.constant 0 : index
    %7 = vector.load %arg5[%c0_6, %c0_7, %c0_8] : memref<1x8x64xf32, #tpu.memory_space<vmem>>, vector<1x8x64xf32>
    %8 = vector.shape_cast %7 : vector<1x8x64xf32> to vector<8x64xf32>
    %9 = vector.shape_cast %6 : vector<8x64xf32> to vector<1x8x64xf32>
    tpu.vector_store %arg5[%c0_6, %c0_7, %c0_8], %9 {strides = array<i32>} : memref<1x8x64xf32, #tpu.memory_space<vmem>>, vector<1x8x64xf32>,
    return
  }
  func.func @transform_0(%arg0: i32, %arg1: i32) -> (i32, i32, i32) {
    %c0_i32 = arith.constant 0 : i32
    %c0_i32_0 = arith.constant 0 : i32
    return %arg0, %c0_i32, %arg1 : i32, i32, i32
  }
  func.func @transform_1(%arg0: i32, %arg1: i32) -> (i32, i32) {
    %c0_i32 = arith.constant 0 : i32
    %c0_i32_0 = arith.constant 0 : i32
    %c0_i32_1 = arith.constant 0 : i32
    return %c0_i32, %c0_i32_0 : i32, i32
  }
  func.func @transform_2(%arg0: i32, %arg1: i32) -> (i32, i32) {
    %c0_i32 = arith.constant 0 : i32
    %c0_i32_0 = arith.constant 0 : i32
    %c0_i32_1 = arith.constant 0 : i32
    return %c0_i32, %c0_i32_0 : i32, i32
  }
  func.func @transform_3(%arg0: i32, %arg1: i32) -> (i32, i32, i32) {
    %c0_i32 = arith.constant 0 : i32
    %c0_i32_0 = arith.constant 0 : i32
    return %arg0, %c0_i32, %arg1 : i32, i32, i32
  }
}

</mosaic_0001>

<bundles_post_ra>
// kernel: downsample_layer.1
= control target key start
LH: loop header
LB: loop body
LE: loop exit
PB: predicated region body
PF: predicated region fallthrough
CT: control target
= control target key end

     0   :  { %s459_s12 = smov 0   ;;  %s461_s13 = smov 0   ;;  %s498_s0 = inlined_call_operand.vmem [shape: f32[2,16,64], index: 0, kind: input, shape index: {}]   ;;  %s499_s1 = inlined_call_operand.vmem [shape: f32[8,16], index: 1, kind: input, shape index: {}]   ;;  %s500_s2 = inlined_call_operand.vmem [shape: f32[8,1], index: 2, kind: input, shape index: {}]   ;;  %s501_s3 = inlined_call_operand.vmem [shape: f32[2,8,64], index: 3, kind: output, shape index: {}]  }
   0x1   :  { %s463_s14 = smov 0  }
   0x2 LB: > { %s25_s15 = sadd.s32 1, %s430_s13  ;;  %p366_p0 = scmp.ge.s32.totalorder %s434_s14, 1  ;;  %s434_s14 = sphi %s463_s14, %s13_s14   ;;  %s430_s13 = sphi %s461_s13, %s503_s13   ;;  %s426_s12 = sphi %s459_s12, %s502_s12  }
   0x3   : > { %p27_p1 = scmp.ge.s32.totalorder %s25_s15, 2  ;;  %p156_p2 = scmp.lt.s32.totalorder %s434_s14, 3 }
   0x5   : > { %s505_s15 = smov (%p27_p1, %s25_s15), 0  ;;  %p157_p3 = pnand %p366_p0, %p156_p2 }
   0x6   : > { %p185_p4 = scmp.lt.s32.totalorder (!%p157_p3), %s426_s12, 1 }
   0x7   : > { %160 = sbr.rel (%p157_p3) target bundleno = 215 (0xd7), region = 32 }
   0xc   : > { %v436_v0 = vmov 0.0   ;;  %vm437_vm0 = vmmov 0   ;;  %v201_v1 = vld [vmem:[%s500_s2] sm:$0xff]  ;;  %s507_s12 = smov (!%p185_p4, %s426_s12), 1  ;;  %v438_v2 = vmov 0   ;;  %vm209_vm1 = vcmask 130048  }
   0xd   : > { %377 = vmatprep.subr.mxu0 %v436_v0  ;;  %381 = vmatprep.mubr.msk.f32.mxu0 %vm437_vm0, %v436_v0  ;;  %s373_s18 = sshll.u32 %s507_s12, 4  ;;  %v200_v5 = vld [vmem:[%s499_s1] sm:$0xff]  ;;  %s369_s24 = sshll.u32 %s507_s12, 3  ;;  %vm283_vm2 = vcmask 523264  }
   0xe   : > { %411 = vset.pattern.permute.xlu0 %v438_v2  ;;  %s192_s21 = scalar_lea.vmem %s498_s0, %s373_s18  ;;  %s199_s27 = scalar_lea.vmem %s501_s3, %s369_s24 }
   0xf   : > { %206 = vperm.xlu0 %411, %v201_v1   ;;  %v203_v3 = vld [vmem:[%s192_s21 + $0x8] sm:$0xff]  ;;  %v202_v4 = vld [vmem:[%s192_s21] sm:$0xff] }
  0x10   : > { %378 = vmatpush3.msra.mxu0 %v203_v3 }
  0x11   : > { %379 = vmatprep.subr.mxu0 %v436_v0 }
  0x12   : > { %380 = vmatpush3.msra.mxu0 %v202_v4 }
  0x13   : > { %382 = vmatmul.mubr.msk.f32.vlgmr.msra.gmra.mxu0 %vm209_vm1, %v200_v5 }
  0x8a   : > { %v207_v6 = vpop.permute.xlu0 %206 }
  0xd3   : > { %v279_v7 = vpop.f32.mrf.mxu0 }
  0xd4   : > { %v280_v8 = vadd.f32 %v279_v7, %v207_v6 }
  0xd5   : > { %v383_v9 = vpop.f32.mrf.mxu0 }
  0xd6   : > { %284 = vst.msk [vmem:[%s199_s27] sm:$0xff] %vm283_vm2, %v280_v8 }
  0xd7 PF: > { %s13_s14 = sadd.s32 1, %s434_s14   ;;  %s502_s12 = smov %s430_s13 }
  0xd8   : > { %p10_p5 = scmp.ge.s32.totalorder %s13_s14, 4   ;;  %s503_s13 = smov %s505_s15 }
  0xda   :  { %12 = sbr.rel (!%p10_p5) target bundleno = 2 (0x2), region = 62 }

</bundles_post_ra>
